<compile_context>
chip_gen: v6e
topology: v6e:2x2x1
jax: 0.10.0
libtpu: 0.0.40
codegen_flags: <defaults>
</compile_context>

<pallas_src>
import functools
import math

import jax
import jax.numpy as jnp
from jax import lax
from jax.experimental import pallas as pl
from jax.experimental.pallas import tpu as pltpu


def _round_up(x, m):
    return -(-x // m) * m


def _detect_vmem_limit():
    try:
        info = pltpu.get_tpu_info()
        cap = int(getattr(info, "vmem_capacity_bytes", 0) or 0)
    except Exception:
        cap = 0
    # 128 MiB parts (v5e / v6e): allow 64 MiB scoped; otherwise stay at 32 MiB.
    return 64 * 1024 * 1024 if cap >= 128 * 1024 * 1024 else 32 * 1024 * 1024


_VMEM_LIMIT = _detect_vmem_limit()


def _bspec(shape, index_map, depth=None):
    """BlockSpec with optional multi-buffering (guarded for API availability)."""
    if depth is not None and hasattr(pl, "Buffered"):
        try:
            return pl.BlockSpec(shape, index_map, pipeline_mode=pl.Buffered(depth))
        except Exception:
            pass
    return pl.BlockSpec(shape, index_map)


# ----------------------------------------------------------------------------
# Fused Pallas matmul:  C = act(scale * (LN?(A) @ B) + bias)
# ----------------------------------------------------------------------------
def _mm_kernel_nk1(a_ref, b_ref, bias_ref, o_ref, *, scale, act, ln, eps):
    a = a_ref[...]
    if ln:                                   # fused pre-norm LayerNorm prologue
        a = a.astype(jnp.float32)
        mu = jnp.mean(a, axis=-1, keepdims=True)
        xc = a - mu
        var = jnp.mean(xc * xc, axis=-1, keepdims=True)
        a = xc * lax.rsqrt(var + eps)
    a = a.astype(jnp.bfloat16)
    r = jnp.dot(a, b_ref[...], preferred_element_type=jnp.float32)
    if scale != 1.0:
        r = r * scale
    r = r + bias_ref[...]
    if act == 'relu':
        r = jnp.maximum(r, 0.0)
    o_ref[...] = r.astype(o_ref.dtype)


def _mm_kernel_acc(a_ref, b_ref, bias_ref, o_ref, acc_ref, *, nk, scale, act):
    k = pl.program_id(2)

    @pl.when(k == 0)
    def _():
        acc_ref[...] = jnp.zeros_like(acc_ref)

    acc_ref[...] += jnp.dot(a_ref[...], b_ref[...],
                            preferred_element_type=jnp.float32)

    @pl.when(k == nk - 1)
    def _():
        r = acc_ref[...]
        if scale != 1.0:
            r = r * scale
        r = r + bias_ref[...]
        if act == 'relu':
            r = jnp.maximum(r, 0.0)
        o_ref[...] = r.astype(o_ref.dtype)


@functools.partial(jax.jit,
                   static_argnames=('scale', 'act', 'ln', 'out_dtype', 'eps'))
def pallas_matmul(a, b, bias=None, *, scale=1.0, act=None, ln=False,
                  out_dtype=jnp.float32, eps=1e-5):
    """(M,K) x (K,N) -> (M,N) = act(scale * LN?(a) @ b + bias)."""
    M, K = a.shape
    K2, N = b.shape
    assert K == K2
    b = b.astype(jnp.bfloat16)

    # ---- N tiles: always lane-dense (multiple of 128) -----------------------
    Np = _round_up(N, 128)
    BN = 128 if (M <= 256 or Np % 256 != 0) else 256

    # ---- K tiles: only tile (and pad) K when it is large --------------------
    if K >= 1024 and not ln:
        Kp = _round_up(K, 128)
        TK = max(t for t in (512, 384, 256, 128) if Kp % t == 0)
    else:
        Kp = TK = K                        # single K step, no K padding at all
    nk = Kp // TK

    # ---- M tiles: big tiles for tall conv matmuls ---------------------------
    if M >= 512:
        BM = 512
        Mp = _round_up(M, BM)
    else:
        BM = Mp = _round_up(max(M, 8), 8)

    a = a.astype(jnp.float32 if ln else jnp.bfloat16)
    if (Mp, Kp) != (M, K):
        a = jnp.pad(a, ((0, Mp - M), (0, Kp - K)))
    if (Kp, Np) != (K, N):
        b = jnp.pad(b, ((0, Kp - K), (0, Np - N)))
    if bias is None:
        bias2 = jnp.zeros((1, Np), jnp.float32)
    else:
        bias2 = bias.reshape(1, N).astype(jnp.float32)
        if Np != N:
            bias2 = jnp.pad(bias2, ((0, 0), (0, Np - N)))

    if nk == 1:
        kernel = functools.partial(_mm_kernel_nk1, scale=float(scale),
                                   act=act, ln=ln, eps=float(eps))
        out = pl.pallas_call(
            kernel,
            out_shape=jax.ShapeDtypeStruct((Mp, Np), out_dtype),
            grid=(Mp // BM, Np // BN),
            in_specs=[pl.BlockSpec((BM, Kp), lambda i, j: (i, 0)),
                      pl.BlockSpec((Kp, BN), lambda i, j: (0, j)),
                      pl.BlockSpec((1, BN), lambda i, j: (0, j))],
            out_specs=pl.BlockSpec((BM, BN), lambda i, j: (i, j)),
            compiler_params=pltpu.CompilerParams(
                dimension_semantics=("parallel", "parallel"),
                vmem_limit_bytes=_VMEM_LIMIT),
        )(a, b, bias2)
    else:
        kernel = functools.partial(_mm_kernel_acc, nk=nk, scale=float(scale),
                                   act=act)
        out = pl.pallas_call(
            kernel,
            out_shape=jax.ShapeDtypeStruct((Mp, Np), out_dtype),
            grid=(Mp // BM, Np // BN, nk),
            in_specs=[_bspec((BM, TK), lambda i, j, k: (i, k), depth=3),
                      _bspec((TK, BN), lambda i, j, k: (k, j), depth=3),
                      pl.BlockSpec((1, BN), lambda i, j, k: (0, j))],
            out_specs=pl.BlockSpec((BM, BN), lambda i, j, k: (i, j)),
            scratch_shapes=[pltpu.VMEM((BM, BN), jnp.float32)],
            compiler_params=pltpu.CompilerParams(
                dimension_semantics=("parallel", "parallel", "arbitrary"),
                vmem_limit_bytes=_VMEM_LIMIT),
        )(a, b, bias2)

    if (Mp, Np) != (M, N):
        out = out[:M, :N]
    return out


# ----------------------------------------------------------------------------
# Direct (fused-im2col) 3x3 stride-1 conv Pallas kernel
#   The padded NHWC image is flattened to (Hp*Wp, C); every kernel tap is a
#   contiguous row-range of that flattened image, so no im2col tensor is ever
#   written to HBM.  Junk columns (width padding) are computed and discarded.
# ----------------------------------------------------------------------------
def _conv3x3_kernel(x_ref, w_ref, o_ref, acc_ref, *, Wp, M, scale, act):
    acc_ref[...] = jnp.dot(x_ref[0, pl.ds(0, M), :], w_ref[0],
                           preferred_element_type=jnp.float32)
    for t in range(1, 9):
        off = (t // 3) * Wp + (t % 3)
        acc_ref[...] += jnp.dot(x_ref[0, pl.ds(off, M), :], w_ref[t],
                                preferred_element_type=jnp.float32)
    r = acc_ref[...]
    if scale != 1.0:
        r = r * scale
    if act == 'relu':
        r = jnp.maximum(r, 0.0)
    o_ref[0] = r.astype(o_ref.dtype)


@functools.partial(jax.jit, static_argnames=('scale', 'act'))
def conv3x3_s1(x, w_mat, *, scale=1.0, act=None):
    """3x3 conv, stride 1, padding 1.  x: (NB,H,W,C) NHWC; w_mat: (9*C, O)."""
    NB, H, W, C = x.shape
    O = w_mat.shape[1]
    Op = _round_up(O, 128)                       # lane-dense output stores
    Ho, Wo = H, W
    Wp = Wo + 2
    Hp = Ho + 3                                  # top pad 1, bottom pad 2
    M = Ho * Wp

    x = x.astype(jnp.bfloat16)
    xp = jnp.pad(x, ((0, 0), (1, 2), (1, 1), (0, 0)))
    xf = xp.reshape(NB, Hp * Wp, C)

    w = w_mat.astype(jnp.bfloat16)
    if Op != O:
        w = jnp.pad(w, ((0, 0), (0, Op - O)))
    w_taps = w.reshape(9, C, Op)

    kernel = functools.partial(_conv3x3_kernel, Wp=Wp, M=M,
                               scale=float(scale), act=act)
    out = pl.pallas_call(
        kernel,
        out_shape=jax.ShapeDtypeStruct((NB, M, Op), jnp.bfloat16),
        grid=(NB,),
        in_specs=[pl.BlockSpec((1, Hp * Wp, C), lambda n: (n, 0, 0)),
                  pl.BlockSpec((9, C, Op), lambda n: (0, 0, 0))],
        out_specs=pl.BlockSpec((1, M, Op), lambda n: (n, 0, 0)),
        scratch_shapes=[pltpu.VMEM((M, Op), jnp.float32)],
        compiler_params=pltpu.CompilerParams(
            dimension_semantics=("parallel",),
            vmem_limit_bytes=_VMEM_LIMIT),
    )(xf, w_taps)
    out = out.reshape(NB, Ho, Wp, Op)[:, :, :Wo, :O]
    return out


# ----------------------------------------------------------------------------
# LayerNorm Pallas kernel (gamma=1, beta=0) -- only used for the final norms.
# ----------------------------------------------------------------------------
def _ln_kernel(x_ref, o_ref, *, eps):
    x = x_ref[...]
    mu = jnp.mean(x, axis=-1, keepdims=True)
    xc = x - mu
    var = jnp.mean(xc * xc, axis=-1, keepdims=True)
    o_ref[...] = xc * lax.rsqrt(var + eps)


@functools.partial(jax.jit, static_argnames=('eps',))
def layer_norm(x, eps=1e-5):
    shp = x.shape
    C = shp[-1]
    x2 = x.reshape(-1, C).astype(jnp.float32)
    M = x2.shape[0]
    if M <= 256:
        BM = Mp = _round_up(max(M, 8), 8)
    else:
        BM = 256
        Mp = _round_up(M, BM)
    if Mp != M:
        x2 = jnp.pad(x2, ((0, Mp - M), (0, 0)))
    out = pl.pallas_call(
        functools.partial(_ln_kernel, eps=eps),
        out_shape=jax.ShapeDtypeStruct((Mp, C), jnp.float32),
        grid=(Mp // BM,),
        in_specs=[pl.BlockSpec((BM, C), lambda i: (i, 0))],
        out_specs=pl.BlockSpec((BM, C), lambda i: (i, 0)),
        compiler_params=pltpu.CompilerParams(
            dimension_semantics=("parallel",),
            vmem_limit_bytes=_VMEM_LIMIT),
    )(x2)
    if Mp != M:
        out = out[:M]
    return out.reshape(shp)


# ----------------------------------------------------------------------------
# Basic building blocks (glue around the Pallas kernels)
# ----------------------------------------------------------------------------
@functools.partial(jax.jit, static_argnames=('act', 'ln', 'out_dtype'))
def linear(x, p, act=None, ln=False, out_dtype=jnp.float32):
    shp = x.shape
    x2 = x.reshape(-1, shp[-1])
    y = pallas_matmul(x2, p['w'], p['b'], act=act, ln=ln, out_dtype=out_dtype)
    return y.reshape(shp[:-1] + (p['w'].shape[1],))


# TODO(synk): per-output-channel scale/shift would be needed for real
# pretrained BatchNorm stats; the scalar is exact for running stats 0/1, g=1,b=0.
_BN_SCALE = 1.0 / math.sqrt(1.0 + 1e-5)


@functools.partial(jax.jit,
                   static_argnames=('kh', 'kw', 'stride', 'padding',
                                    'scale', 'act'))
def conv2d_im2col(x, w_mat, *, kh, kw, stride, padding, scale=1.0, act=None):
    """Fallback conv path (stride!=1 / 7x7 / 1x1).  x: NHWC; w_mat: (kh*kw*C,O)."""
    N, H, W, C = x.shape
    O = w_mat.shape[1]
    x = x.astype(jnp.bfloat16)
    if padding:
        x = jnp.pad(x, ((0, 0), (padding, padding), (padding, padding), (0, 0)))
    Ho = (H + 2 * padding - kh) // stride + 1
    Wo = (W + 2 * padding - kw) // stride + 1
    cols = [x[:, i:i + stride * Ho:stride, j:j + stride * Wo:stride, :]
            for i in range(kh) for j in range(kw)]
    pt = cols[0] if len(cols) == 1 else jnp.concatenate(cols, axis=-1)
    pt = pt.reshape(N * Ho * Wo, kh * kw * C)
    y = pallas_matmul(pt, w_mat, scale=scale, act=act, out_dtype=jnp.bfloat16)
    return y.reshape(N, Ho, Wo, O)


def maxpool3x3s2p1(x):  # NHWC
    return lax.reduce_window(x, jnp.array(-jnp.inf, dtype=x.dtype), lax.max,
                             window_dimensions=(1, 3, 3, 1),
                             window_strides=(1, 2, 2, 1),
                             padding=((0, 0), (1, 1), (1, 1), (0, 0)))


def l2_normalize(x, axis, eps=1e-12):
    n = jnp.sqrt(jnp.sum(x * x, axis=axis, keepdims=True))
    return x / jnp.maximum(n, eps)


def generate_square_subsequent_mask(sz):
    return jnp.where(jnp.tril(jnp.ones((sz, sz), dtype=bool)),
                     0.0, -jnp.inf).astype(jnp.float32)


def positional_encoding_table(max_len, dim):
    pos = jnp.arange(max_len, dtype=jnp.float32)[:, None]
    div = jnp.exp(jnp.arange(0, dim, 2, dtype=jnp.float32)
                  * -(math.log(10000.0) / dim))
    pe = jnp.zeros((max_len, dim), jnp.float32)
    pe = pe.at[:, 0::2].set(jnp.sin(pos * div))
    pe = pe.at[:, 1::2].set(jnp.cos(pos * div))
    return pe


def add_position(x, pe):
    # x: (T, B, C); PositionalEncoding: x*sqrt(dim) + pe[:T] (dropout=identity)
    T, B, C = x.shape
    return x * math.sqrt(C) + pe[:T][:, None, :]


# ----------------------------------------------------------------------------
# Multi-head attention / transformer layers (pre-norm, eval-mode dropout)
# The pre-norm LayerNorm of the *query* path is fused into the QKV/Q matmul.
# ----------------------------------------------------------------------------
def mha(query, key, value, p, attn_mask=None, nhead=8, ln_query=False):
    Tq, B, C = query.shape
    Tk = key.shape[0]
    hd = C // nhead
    if 'qkv' in p:                                 # fused self-attention proj
        qkv = linear(query, p['qkv'], ln=ln_query)
        q, k, v = jnp.split(qkv, 3, axis=-1)
    else:                                          # cross-attn: fused K/V proj
        q = linear(query, p['q'], ln=ln_query)
        kv = linear(key, p['kv'])
        k, v = jnp.split(kv, 2, axis=-1)

    def split_heads(x, T):
        return x.reshape(T, B, nhead, hd).transpose(1, 2, 0, 3)   # (B,H,T,hd)

    qh, kh_, vh = split_heads(q, Tq), split_heads(k, Tk), split_heads(v, Tk)
    # TODO(synk): tiny (T<=32) attention score/value batched matmuls stay in
    # plain JAX; all projections above/below run on the Pallas MXU kernel.
    scores = jnp.einsum('bhqd,bhkd->bhqk', qh, kh_) / math.sqrt(hd)
    if attn_mask is not None:
        scores = scores + attn_mask[None, None]
    attn = jax.nn.softmax(scores, axis=-1)
    out = jnp.einsum('bhqk,bhkd->bhqd', attn, vh)
    out = out.transpose(2, 0, 1, 3).reshape(Tq, B, C)
    return linear(out, p['o'])


def enc_layer(p, src, mask=None):
    # self-attn (pre-norm LN fused into qkv projection)
    src2 = mha(src, src, src, p['attn'], attn_mask=mask, ln_query=True)
    src = src + src2
    # FFN (pre-norm LN + ReLU fused into lin1; bf16 hidden activation)
    h = linear(src, p['lin1'], act='relu', ln=True, out_dtype=jnp.bfloat16)
    src2 = linear(h, p['lin2'])
    return src + src2


def run_encoder(layers, src, final_norm):
    out = src
    for lp in layers:
        out = enc_layer(lp, out)
    if final_norm:
        out = layer_norm(out)
    return out


def dec_layer(p, tgt, memory, tgt_mask):
    t2 = mha(tgt, tgt, tgt, p['self_attn'], attn_mask=tgt_mask, ln_query=True)
    tgt = tgt + t2
    t2 = mha(tgt, memory, memory, p['cross_attn'], ln_query=True)
    tgt = tgt + t2
    h = linear(tgt, p['lin1'], act='relu', ln=True, out_dtype=jnp.bfloat16)
    t2 = linear(h, p['lin2'])
    return tgt + t2


def run_decoder(layers, tgt, memory, tgt_mask):
    # return_intermediate_dec: only the final (normalized) layer output is
    # consumed downstream, so the per-layer intermediate norms are skipped.
    out = tgt
    for lp in layers:
        out = dec_layer(lp, out, memory, tgt_mask)
    return layer_norm(out)


def mlp2(layers, x, act):
    if act == 'relu':
        h = linear(x, layers[0], act='relu', out_dtype=jnp.bfloat16)
    else:
        h = jax.nn.gelu(linear(x, layers[0]), approximate=False)
    return linear(h, layers[1])


# ----------------------------------------------------------------------------
# ResNet18-style feature encoder (Conv(1,64,7,2,3) + resnet18 children[1:-2])
# NHWC end-to-end; BN(eval)+ReLU fused into the conv epilogues; 3x3/s1 convs
# use the fused-im2col Pallas kernel, others the im2col+matmul path.
# ----------------------------------------------------------------------------
RESNET_CFG = [(64, 64, 1, False), (64, 64, 1, False),
              (64, 128, 2, True), (128, 128, 1, False),
              (128, 256, 2, True), (256, 256, 1, False),
              (256, 512, 2, True), (512, 512, 1, False)]


def resnet_forward(p, x_nchw):
    x = jnp.transpose(x_nchw, (0, 2, 3, 1))                      # NCHW -> NHWC
    x = conv2d_im2col(x, p['conv1'], kh=7, kw=7, stride=2, padding=3,
                      scale=_BN_SCALE, act='relu')
    x = maxpool3x3s2p1(x)
    for bp, (cin, cout, stride, has_down) in zip(p['blocks'], RESNET_CFG):
        identity = x
        if stride == 1:
            out = conv3x3_s1(x, bp['conv1'], scale=_BN_SCALE, act='relu')
        else:
            out = conv2d_im2col(x, bp['conv1'], kh=3, kw=3, stride=stride,
                                padding=1, scale=_BN_SCALE, act='relu')
        out = conv3x3_s1(out, bp['conv2'], scale=_BN_SCALE, act=None)
        if has_down:
            identity = conv2d_im2col(x, bp['down'], kh=1, kw=1, stride=stride,
                                     padding=0, scale=_BN_SCALE, act=None)
        x = jax.nn.relu(out + identity)
    return x                                                      # (N,h',w',512)


# ----------------------------------------------------------------------------
# Parameter initialization (deterministic, xavier-uniform, weights in bf16)
# ----------------------------------------------------------------------------
class KeyGen:
    def __init__(self, key):
        self.key = key

    def __call__(self):
        self.key, sub = jax.random.split(self.key)
        return sub


def xavier(key, shape, fan_in, fan_out):
    limit = math.sqrt(6.0 / (fan_in + fan_out))
    return jax.random.uniform(key, shape, jnp.float32, -limit, limit)


def make_linear(kg, din, dout):
    return {'w': xavier(kg(), (din, dout), din, dout).astype(jnp.bfloat16),
            'b': jnp.zeros((dout,), jnp.float32)}


def make_conv(kg, o, c, kh, kw):
    w = xavier(kg(), (o, c, kh, kw), c * kh * kw, o * kh * kw)
    # pre-transform to im2col layout (kh,kw,C,O) -> (kh*kw*C, O), stored bf16
    return jnp.transpose(w, (2, 3, 1, 0)).reshape(kh * kw * c, o) \
              .astype(jnp.bfloat16)


def make_mha_self(kg, d):
    return {'qkv': make_linear(kg, d, 3 * d), 'o': make_linear(kg, d, d)}


def make_mha_cross(kg, d):
    return {'q': make_linear(kg, d, d), 'kv': make_linear(kg, d, 2 * d),
            'o': make_linear(kg, d, d)}


def make_enc_layer(kg, d, dff):
    return {'attn': make_mha_self(kg, d),
            'lin1': make_linear(kg, d, dff),
            'lin2': make_linear(kg, dff, d)}


def make_dec_layer(kg, d, dff):
    return {'self_attn': make_mha_self(kg, d),
            'cross_attn': make_mha_cross(kg, d),
            'lin1': make_linear(kg, d, dff),
            'lin2': make_linear(kg, dff, d)}


def make_resnet_encoder(kg):
    p = {'conv1': make_conv(kg, 64, 1, 7, 7)}
    blocks = []
    for cin, cout, stride, has_down in RESNET_CFG:
        b = {'conv1': make_conv(kg, cout, cin, 3, 3),
             'conv2': make_conv(kg, cout, cout, 3, 3)}
        if has_down:
            b['down'] = make_conv(kg, cout, cin, 1, 1)
        blocks.append(b)
    p['blocks'] = blocks
    return p


def init_params(key, d_model=512, dff=2048):
    kg = KeyGen(key)
    P = {}
    P['feat_encoder'] = make_resnet_encoder(kg)
    P['base_encoder'] = [make_enc_layer(kg, d_model, dff) for _ in range(2)]
    P['writer_head'] = [make_enc_layer(kg, d_model, dff) for _ in range(1)]
    P['glyph_head'] = [make_enc_layer(kg, d_model, dff) for _ in range(1)]
    # TODO(synk): Content_TR source not provided; implemented as the standard
    # SDT content encoder (resnet18-style feat encoder + 2-layer pre-norm
    # transformer encoder with final LayerNorm + positional encoding).
    P['content_encoder'] = {'feat': make_resnet_encoder(kg),
                            'enc': [make_enc_layer(kg, d_model, dff)
                                    for _ in range(2)]}
    P['wri_decoder'] = [make_dec_layer(kg, d_model, dff) for _ in range(2)]
    P['gly_decoder'] = [make_dec_layer(kg, d_model, dff) for _ in range(2)]
    P['pro_mlp_writer'] = [make_linear(kg, 512, 4096),
                           make_linear(kg, 4096, 256)]
    P['pro_mlp_character'] = [make_linear(kg, 512, 4096),
                              make_linear(kg, 4096, 256)]
    P['seq_to_emb'] = [make_linear(kg, 5, 256), make_linear(kg, 256, d_model)]
    P['emb_to_seq'] = [make_linear(kg, d_model, 256), make_linear(kg, 256, 123)]
    return P


# ----------------------------------------------------------------------------
# random_double_sampling (torch.rand replaced by jax.random, fixed key)
# ----------------------------------------------------------------------------
def random_double_sampling(x, key, ratio=0.25):
    L, B, N, D = x.shape
    x = x.transpose(1, 2, 0, 3)                      # B N L D
    noise = jax.random.uniform(key, (B, N, L))
    ids_shuffle = jnp.argsort(noise, axis=2)
    anchor_tokens, pos_tokens = int(L * ratio), int(L * 2 * ratio)
    ids_anchor = ids_shuffle[:, :, :anchor_tokens]
    ids_pos = ids_shuffle[:, :, anchor_tokens:pos_tokens]
    x_anchor = jnp.take_along_axis(x, ids_anchor[..., None], axis=2)
    x_pos = jnp.take_along_axis(x, ids_pos[..., None], axis=2)
    return x_anchor, x_pos


# ----------------------------------------------------------------------------
# Full SDT_Generator forward
# ----------------------------------------------------------------------------
def sdt_forward(P, style_imgs, seq, char_img, pe, sample_key):
    batch_size, num_imgs, in_planes, h, w = style_imgs.shape
    anchor_num = num_imgs // 2

    # ---- style feature encoder (NHWC inside, (T, B*N, 512) out) ----
    x = style_imgs.reshape(-1, in_planes, h, w)
    style_embe = resnet_forward(P['feat_encoder'], x)        # (B*N, h', w', 512)
    BN_, hh, ww, Cf = style_embe.shape
    style_embe = style_embe.reshape(BN_, hh * ww, Cf).transpose(1, 0, 2)

    FEAT_ST_ENC = add_position(style_embe, pe)
    memory = run_encoder(P['base_encoder'], FEAT_ST_ENC, final_norm=False)
    writer_memory = run_encoder(P['writer_head'], memory, final_norm=True)
    glyph_memory = run_encoder(P['glyph_head'], memory, final_norm=True)

    T = writer_memory.shape[0]
    b, pgrp, n = batch_size, 2, anchor_num

    def regroup(m):  # 't (b p n) c -> t (p b) n c'
        return m.reshape(T, b, pgrp, n, 512).transpose(0, 2, 1, 3, 4) \
                .reshape(T, pgrp * b, n, 512)

    writer_memory = regroup(writer_memory)
    glyph_memory = regroup(glyph_memory)

    # ---- writer NCE branch ----
    memory_fea = writer_memory.transpose(0, 2, 1, 3).reshape(T * n, pgrp * b, 512)
    compact_fea = jnp.mean(memory_fea, axis=0)
    pro_emb = mlp2(P['pro_mlp_writer'], compact_fea, act='gelu')
    query_emb = pro_emb[:batch_size]
    pos_emb = pro_emb[batch_size:]
    nce_emb = jnp.stack([query_emb, pos_emb], axis=1)
    nce_emb = l2_normalize(nce_emb, axis=2)

    # ---- glyph NCE branch ----
    patch_emb = glyph_memory[:, :batch_size]                     # (L, B, N, D)
    anc, positive = random_double_sampling(patch_emb, sample_key)
    D = anc.shape[-1]
    anc = anc.reshape(batch_size, -1, D)
    anc_compact = jnp.mean(anc, axis=1, keepdims=True)
    anc_compact = mlp2(P['pro_mlp_character'], anc_compact, act='gelu')
    positive = positive.reshape(batch_size, -1, D)
    positive_compact = jnp.mean(positive, axis=1, keepdims=True)
    positive_compact = mlp2(P['pro_mlp_character'], positive_compact, act='gelu')
    nce_emb_patch = jnp.concatenate([anc_compact, positive_compact], axis=1)
    nce_emb_patch = l2_normalize(nce_emb_patch, axis=2)

    # ---- styles for decoders ----
    writer_style = memory_fea[:, :batch_size, :]
    glyph_style = glyph_memory[:, :batch_size]
    glyph_style = glyph_style.transpose(0, 2, 1, 3).reshape(T * n, batch_size, 512)

    # ---- target sequence ----
    seq_emb = mlp2(P['seq_to_emb'], seq, act='relu').transpose(1, 0, 2)  # (T,B,C)
    Tseq = seq_emb.shape[0]

    ce = resnet_forward(P['content_encoder']['feat'], char_img)  # (n, h, w, 512)
    nC, ch, cw, Cf = ce.shape
    ce = ce.reshape(nC, ch * cw, Cf).transpose(1, 0, 2)          # (h*w, n, c)
    ce = add_position(ce, pe)
    char_feat = run_encoder(P['content_encoder']['enc'], ce, final_norm=True)
    char_emb = jnp.mean(char_feat, axis=0)[None]                 # (1, n, c)

    tgt = jnp.concatenate([char_emb, seq_emb], axis=0)           # (T+1, B, C)
    tgt_mask = generate_square_subsequent_mask(Tseq + 1)
    tgt = add_position(tgt, pe)

    wri_last = run_decoder(P['wri_decoder'], tgt, writer_style, tgt_mask)
    gly_last = run_decoder(P['gly_decoder'], wri_last, glyph_style, tgt_mask)

    h_out = gly_last.transpose(1, 0, 2)                          # (B, T+1, C)
    pred_sequence = mlp2(P['emb_to_seq'], h_out, act='relu')     # (B, T+1, 123)
    return pred_sequence, nce_emb, nce_emb_patch


# ----------------------------------------------------------------------------
if __name__ == "__main__":
    root = jax.random.PRNGKey(0)
    k_param, k_style, k_seq, k_char, k_sample = jax.random.split(root, 5)

    params = init_params(k_param)
    pe = positional_encoding_table(512, 512)

    # Small but valid shapes: style images 64x64 -> 2x2 feature map -> L=4
    # (required so random_double_sampling keeps >=1 anchor token).
    batch_size, num_imgs = 2, 4
    style_imgs = jax.random.normal(k_style, (batch_size, num_imgs, 1, 64, 64),
                                   jnp.float32)
    seq = jax.random.normal(k_seq, (batch_size, 8, 5), jnp.float32)
    char_img = jax.random.normal(k_char, (batch_size, 1, 64, 64), jnp.float32)

    pred_sequence, nce_emb, nce_emb_patch = sdt_forward(
        params, style_imgs, seq, char_img, pe, k_sample)

    jax.block_until_ready((pred_sequence, nce_emb, nce_emb_patch))
    assert pred_sequence.shape == (batch_size, 9, 123)
    assert nce_emb.shape == (batch_size, 2, 256)
    assert nce_emb_patch.shape == (batch_size, 2, 256)
    print("KERNEL_OK")
</pallas_src>

<mosaic_0001>
module attributes {stable_mosaic.version = 11 : i64} {
  func.func @_mm_kernel_nk1(%arg0: i32, %arg1: i32, %arg2: memref<512x49xbf16, #tpu.memory_space<vmem>>, %arg3: memref<49x128xbf16, #tpu.memory_space<vmem>>, %arg4: memref<1x128xf32, #tpu.memory_space<vmem>>, %arg5: memref<512x128xbf16, #tpu.memory_space<vmem>>) attributes {dimension_semantics = [#tpu.dimension_semantics<parallel>, #tpu.dimension_semantics<parallel>], iteration_bounds = array<i64: 16, 1>, scalar_prefetch = 0 : i64, scratch_operands = 0 : i64, tpu.core_type = #tpu.core_type<tc>, window_params = [{transform_indices = @transform_0, window_bounds = array<i64: 512, 49>}, {transform_indices = @transform_1, window_bounds = array<i64: 49, 128>}, {transform_indices = @transform_2, window_bounds = array<i64: 1, 128>}, {transform_indices = @transform_3, window_bounds = array<i64: 512, 128>}]} {
    %c0 = arith.constant 0 : index
    %c0_0 = arith.constant 0 : index
    %0 = vector.load %arg2[%c0, %c0_0] : memref<512x49xbf16, #tpu.memory_space<vmem>>, vector<512x49xbf16>
    %c0_1 = arith.constant 0 : index
    %c0_2 = arith.constant 0 : index
    %1 = vector.load %arg3[%c0_1, %c0_2] : memref<49x128xbf16, #tpu.memory_space<vmem>>, vector<49x128xbf16>
    %cst = arith.constant dense<0.000000e+00> : vector<512x128xf32>
    %2 = tpu.matmul %0, %1, %cst {dimension_numbers = #tpu.dot_dimension_numbers<[1], [0], [0], [1], [0, 0, 1, 1], [], []>} : vector<512x49xbf16>, vector<49x128xbf16>, vector<512x128xf32> -> vector<512x128xf32>
    %cst_3 = arith.constant 0.999994993 : f32
    %3 = vector.broadcast %cst_3 : f32 to vector<512x128xf32>
    %4 = arith.mulf %2, %3 : vector<512x128xf32>
    %c0_4 = arith.constant 0 : index
    %c0_5 = arith.constant 0 : index
    %5 = vector.load %arg4[%c0_4, %c0_5] : memref<1x128xf32, #tpu.memory_space<vmem>>, vector<1x128xf32>
    %6 = vector.broadcast %5 : vector<1x128xf32> to vector<512x128xf32>
    %7 = arith.addf %4, %6 : vector<512x128xf32>
    %cst_6 = arith.constant 0.000000e+00 : f32
    %8 = vector.broadcast %cst_6 : f32 to vector<512x128xf32>
    %9 = arith.maximumf %7, %8 : vector<512x128xf32>
    %10 = arith.truncf %9 : vector<512x128xf32> to vector<512x128xbf16>
    %c0_7 = arith.constant 0 : index
    %c0_8 = arith.constant 0 : index
    %11 = vector.load %arg5[%c0_7, %c0_8] : memref<512x128xbf16, #tpu.memory_space<vmem>>, vector<512x128xbf16>
    tpu.vector_store %arg5[%c0_7, %c0_8], %10 {strides = array<i32>} : memref<512x128xbf16, #tpu.memory_space<vmem>>, vector<512x128xbf16>,
    return
  }
  func.func @transform_0(%arg0: i32, %arg1: i32) -> (i32, i32) {
    %c0_i32 = arith.constant 0 : i32
    %c0_i32_0 = arith.constant 0 : i32
    return %arg0, %c0_i32 : i32, i32
  }
  func.func @transform_1(%arg0: i32, %arg1: i32) -> (i32, i32) {
    %c0_i32 = arith.constant 0 : i32
    %c0_i32_0 = arith.constant 0 : i32
    return %c0_i32, %arg1 : i32, i32
  }
  func.func @transform_2(%arg0: i32, %arg1: i32) -> (i32, i32) {
    %c0_i32 = arith.constant 0 : i32
    %c0_i32_0 = arith.constant 0 : i32
    return %c0_i32, %arg1 : i32, i32
  }
  func.func @transform_3(%arg0: i32, %arg1: i32) -> (i32, i32) {
    %c0_i32 = arith.constant 0 : i32
    return %arg0, %arg1 : i32, i32
  }
}

</mosaic_0001>

<bundles_post_ra>
// kernel: pallas_matmul.1
= control target key start
LH: loop header
LB: loop body
LE: loop exit
PB: predicated region body
PF: predicated region fallthrough
CT: control target
= control target key end

     0   :  { %s2114_s12 = smov 0   ;;  %s2116_s13 = smov 0   ;;  %s2335_s0 = inlined_call_operand.vmem [shape: bf16[8192,49], index: 0, kind: input, shape index: {}]   ;;  %s2336_s1 = inlined_call_operand.vmem [shape: bf16[49,128], index: 1, kind: input, shape index: {}]   ;;  %s2337_s2 = inlined_call_operand.vmem [shape: f32[1,128], index: 2, kind: input, shape index: {}]   ;;  %s2338_s3 = inlined_call_operand.vmem [shape: bf16[8192,128], index: 3, kind: output, shape index: {}]  }
   0x1   :  { %s2118_s14 = smov 0  }
   0x2 LB: > { %s25_s15 = sadd.s32 1, %s2087_s13  ;;  %p1497_p0 = scmp.ge.s32.totalorder %s2091_s14, 1  ;;  %s2091_s14 = sphi %s2118_s14, %s13_s14   ;;  %s2087_s13 = sphi %s2116_s13, %s2340_s13   ;;  %s2083_s12 = sphi %s2114_s12, %s2339_s12  }
   0x3   : > { %p27_p1 = scmp.ge.s32.totalorder %s25_s15, 16  ;;  %p169_p2 = scmp.lt.s32.totalorder %s2091_s14, 17 }
   0x5   : > { %s2342_s15 = smov (%p27_p1, %s25_s15), 0  ;;  %p170_p3 = pnand %p1497_p0, %p169_p2 }
   0x6   : > { %s1498_s20 = sshll.u32 (!%p170_p3), %s2083_s12, 6 }
   0x7   : > { %173 = sbr.rel (%p170_p3) target bundleno = 296 (0x128), region = 32  ;;  %p204_p4 = scmp.lt.s32.totalorder (!%p170_p3), %s1498_s20, 1023 }
   0xc   : > { %v2033_v0 = vld [vmem:[%s2336_s1 + $0x18] ss:$0 sps:$4 sm:$0x11]   ;;  %vm575_vm0 = vcmask 1040384   ;;  %v2093_v1 = vmov 0   ;;  %v2034_v4 = vld [vmem:[%s2336_s1 + $0x10] sm:$0xff]  }
   0xd   : > { %v577_v2 = vsel %vm575_vm0, 65535, %v2093_v1  ;;  %s2344_s20 = smov (!%p204_p4, %s1498_s20), 1023  ;;  %v2035_v5 = vld [vmem:[%s2336_s1 + $0x8] sm:$0xff]   ;;  %v2036_v6 = vld [vmem:[%s2336_s1] sm:$0xff]   ;;  %vm478_vm1 = vcmask 400384  }
   0xe   : > { %v579_v3 = vand.u32 %v2033_v0, %v577_v2  ;;  %s1499_s23 = sshll.u32 %s2344_s20, 2  ;;  %v2221_v43 = vld [vmem:[%s2337_s2] ss:$0 sm:$0xff] }
   0xf   : > { %s2152_s28 = scalar_lea.vmem %s2335_s0, %s1499_s23  ;;  %s2236_s6 = scalar_lea.vmem %s2338_s3, %s1499_s23 }
  0x10   : > { %1928 = vmatprep.subr.bf16.mxu0 %v579_v3  ;;  %2000 = vmatprep.subr.bf16.mxu1 %v579_v3  ;;  %v2037_v7 = vld [vmem:[%s2152_s28] sm:$0xff]   ;;  %v2039_v9 = vld [vmem:[%s2152_s28 + $0x8] sm:$0xff]   ;;  %v2041_v11 = vld [vmem:[%s2152_s28 + $0x10] sm:$0xff]  }
  0x11   : > { %1929 = vmatpush3.bf16.msra.mxu0 %v579_v3  ;;  %2004 = vmatpush3.bf16.msra.mxu1 %v579_v3  ;;  %v2038_v8 = vld [vmem:[%s2152_s28 + $0x80] sm:$0xff]   ;;  %v2040_v10 = vld [vmem:[%s2152_s28 + $0x88] sm:$0xff]   ;;  %v2042_v12 = vld [vmem:[%s2152_s28 + $0x90] sm:$0xff]  }
  0x12   : > { %1930 = vmatprep.subr.bf16.mxu0 %v2034_v4  ;;  %2001 = vmatprep.subr.bf16.mxu1 %v2034_v4  ;;  %v2043_v13 = vld [vmem:[%s2152_s28 + $0x18] sm:$0xff]   ;;  %v2045_v15 = vld [vmem:[%s2152_s28 + $0x20] sm:$0xff]   ;;  %v2047_v17 = vld [vmem:[%s2152_s28 + $0x28] sm:$0xff]  }
  0x13   : > { %1936 = vmatprep.mubr.msk.bf16.mxu0 %vm478_vm1, %v2037_v7  ;;  %1968 = vmatprep.mubr.msk.bf16.mxu1 %vm478_vm1, %v2038_v8  ;;  %v2044_v14 = vld [vmem:[%s2152_s28 + $0x98] sm:$0xff]   ;;  %v2046_v16 = vld [vmem:[%s2152_s28 + $0xa0] sm:$0xff]   ;;  %v2048_v18 = vld [vmem:[%s2152_s28 + $0xa8] sm:$0xff]  }
  0x14   : > { %v2049_v19 = vld [vmem:[%s2152_s28 + $0x30] sm:$0xff]   ;;  %v2051_v21 = vld [vmem:[%s2152_s28 + $0x38] sm:$0xff]   ;;  %v2053_v23 = vld [vmem:[%s2152_s28 + $0x40] sm:$0xff]  }
  0x15   : > { %1931 = vmatpush3.bf16.msra.mxu0 %v2034_v4  ;;  %2005 = vmatpush3.bf16.msra.mxu1 %v2034_v4  ;;  %v2050_v20 = vld [vmem:[%s2152_s28 + $0xb0] sm:$0xff]   ;;  %v2052_v22 = vld [vmem:[%s2152_s28 + $0xb8] sm:$0xff]   ;;  %v2054_v24 = vld [vmem:[%s2152_s28 + $0xc0] sm:$0xff]  }
  0x16   : > { %1932 = vmatprep.subr.bf16.mxu0 %v2035_v5  ;;  %2002 = vmatprep.subr.bf16.mxu1 %v2035_v5  ;;  %v2055_v25 = vld [vmem:[%s2152_s28 + $0x48] sm:$0xff]   ;;  %v2057_v27 = vld [vmem:[%s2152_s28 + $0x50] sm:$0xff]   ;;  %v2059_v29 = vld [vmem:[%s2152_s28 + $0x58] sm:$0xff]  }
  0x17   : > { %v2056_v26 = vld [vmem:[%s2152_s28 + $0xc8] sm:$0xff]   ;;  %v2058_v28 = vld [vmem:[%s2152_s28 + $0xd0] sm:$0xff]   ;;  %v2060_v30 = vld [vmem:[%s2152_s28 + $0xd8] sm:$0xff]  }
  0x18   : > { %v2061_v31 = vld [vmem:[%s2152_s28 + $0x60] sm:$0xff]   ;;  %v2063_v33 = vld [vmem:[%s2152_s28 + $0x68] sm:$0xff]   ;;  %v2065_v35 = vld [vmem:[%s2152_s28 + $0x70] sm:$0xff]  }
  0x19   : > { %1933 = vmatpush3.bf16.msra.mxu0 %v2035_v5  ;;  %2006 = vmatpush3.bf16.msra.mxu1 %v2035_v5  ;;  %v2062_v32 = vld [vmem:[%s2152_s28 + $0xe0] sm:$0xff]   ;;  %v2064_v34 = vld [vmem:[%s2152_s28 + $0xe8] sm:$0xff]   ;;  %v2066_v36 = vld [vmem:[%s2152_s28 + $0xf0] sm:$0xff]  }
  0x1a   : > { %1934 = vmatprep.subr.bf16.mxu0 %v2036_v6  ;;  %2003 = vmatprep.subr.bf16.mxu1 %v2036_v6  ;;  %v2067_v37 = vld [vmem:[%s2152_s28 + $0x78] sm:$0xff]  }
  0x1b   : > { %v2068_v38 = vld [vmem:[%s2152_s28 + $0xf8] sm:$0xff]  }
  0x1d   : > { %1935 = vmatpush3.bf16.msra.mxu0 %v2036_v6  ;;  %2007 = vmatpush3.bf16.msra.mxu1 %v2036_v6 }
  0x20   : > { %1937 = vmatmul.mubr.msk.bf16.vlgmr.msra.gmra.mxu0 %vm478_vm1, %v2039_v9  ;;  %1969 = vmatmul.mubr.msk.bf16.vlgmr.msra.gmra.mxu1 %vm478_vm1, %v2040_v10 }
  0x21   : > { %1940 = vmatprep.mubr.msk.bf16.mxu0 %vm478_vm1, %v2041_v11  ;;  %1972 = vmatprep.mubr.msk.bf16.mxu1 %vm478_vm1, %v2042_v12 }
  0x28   : > { %1941 = vmatmul.mubr.msk.bf16.gmra.mxu0 %vm478_vm1, %v2043_v13  ;;  %1973 = vmatmul.mubr.msk.bf16.gmra.mxu1 %vm478_vm1, %v2044_v14 }
  0x29   : > { %1944 = vmatprep.mubr.msk.bf16.mxu0 %vm478_vm1, %v2045_v15  ;;  %1976 = vmatprep.mubr.msk.bf16.mxu1 %vm478_vm1, %v2046_v16 }
  0x30   : > { %1945 = vmatmul.mubr.msk.bf16.gmra.mxu0 %vm478_vm1, %v2047_v17  ;;  %1977 = vmatmul.mubr.msk.bf16.gmra.mxu1 %vm478_vm1, %v2048_v18 }
  0x31   : > { %1948 = vmatprep.mubr.msk.bf16.mxu0 %vm478_vm1, %v2049_v19  ;;  %1980 = vmatprep.mubr.msk.bf16.mxu1 %vm478_vm1, %v2050_v20 }
  0x38   : > { %1949 = vmatmul.mubr.msk.bf16.gmra.mxu0 %vm478_vm1, %v2051_v21  ;;  %1981 = vmatmul.mubr.msk.bf16.gmra.mxu1 %vm478_vm1, %v2052_v22 }
  0x39   : > { %1952 = vmatprep.mubr.msk.bf16.mxu0 %vm478_vm1, %v2053_v23  ;;  %1984 = vmatprep.mubr.msk.bf16.mxu1 %vm478_vm1, %v2054_v24 }
  0x40   : > { %1953 = vmatmul.mubr.msk.bf16.gmra.mxu0 %vm478_vm1, %v2055_v25  ;;  %1985 = vmatmul.mubr.msk.bf16.gmra.mxu1 %vm478_vm1, %v2056_v26 }
  0x41   : > { %1956 = vmatprep.mubr.msk.bf16.mxu0 %vm478_vm1, %v2057_v27  ;;  %1988 = vmatprep.mubr.msk.bf16.mxu1 %vm478_vm1, %v2058_v28 }
  0x48   : > { %1957 = vmatmul.mubr.msk.bf16.gmra.mxu0 %vm478_vm1, %v2059_v29  ;;  %1989 = vmatmul.mubr.msk.bf16.gmra.mxu1 %vm478_vm1, %v2060_v30 }
  0x49   : > { %1960 = vmatprep.mubr.msk.bf16.mxu0 %vm478_vm1, %v2061_v31  ;;  %1992 = vmatprep.mubr.msk.bf16.mxu1 %vm478_vm1, %v2062_v32 }
  0x50   : > { %1961 = vmatmul.mubr.msk.bf16.gmra.mxu0 %vm478_vm1, %v2063_v33  ;;  %1993 = vmatmul.mubr.msk.bf16.gmra.mxu1 %vm478_vm1, %v2064_v34 }
  0x51   : > { %1964 = vmatprep.mubr.msk.bf16.mxu0 %vm478_vm1, %v2065_v35  ;;  %1996 = vmatprep.mubr.msk.bf16.mxu1 %vm478_vm1, %v2066_v36 }
  0x58   : > { %1965 = vmatmul.mubr.msk.bf16.gmra.mxu0 %vm478_vm1, %v2067_v37  ;;  %1997 = vmatmul.mubr.msk.bf16.gmra.mxu1 %vm478_vm1, %v2068_v38 }
  0xe0   : > { %v1938_v39 = vpop.f32.mrf.mxu0  ;;  %v1970_v40 = vpop.f32.mrf.mxu1 }
  0xe1   : > { %v872_v41 = vmul.f32 0.999995, %v1938_v39  ;;  %v904_v42 = vmul.f32 0.999995, %v1970_v40 }
  0xe2   : > { %v615_v44 = vpop.f32.mrf.mxu0  ;;  %v743_v45 = vpop.f32.mrf.mxu1 }
  0xe3   : > { %v870_v46 = vmul.f32 0.999995, %v615_v44  ;;  %v902_v47 = vmul.f32 0.999995, %v743_v45  ;;  %v943_v50 = vadd.f32 %v2221_v43, %v872_v41  ;;  %v975_v51 = vadd.f32 %v2221_v43, %v904_v42 }
  0xe4   : > { %v1939_v48 = vpop.f32.mrf.mxu0  ;;  %v1971_v49 = vpop.f32.mrf.mxu1 }
  0xe5   : > { %v873_v52 = vmul.f32 0.999995, %v1939_v48  ;;  %v905_v53 = vmul.f32 0.999995, %v1971_v49  ;;  %v941_v56 = vadd.f32 %v2221_v43, %v870_v46  ;;  %v973_v57 = vadd.f32 %v2221_v43, %v902_v47 }
  0xe6   : > { %v618_v54 = vpop.f32.mrf.mxu0  ;;  %v746_v55 = vpop.f32.mrf.mxu1  ;;  %v1007_v0 = vmax.f32 %v943_v50, 0.0  ;;  %v1039_v1 = vmax.f32 %v975_v51, 0.0 }
  0xe7   : > { %v871_v58 = vmul.f32 0.999995, %v618_v54  ;;  %v903_v59 = vmul.f32 0.999995, %v746_v55  ;;  %v944_v60 = vadd.f32 %v2221_v43, %v873_v52  ;;  %v976_v61 = vadd.f32 %v2221_v43, %v905_v53 }
  0xe8   : > { %v1942_v62 = vpop.f32.mrf.mxu0  ;;  %v1974_v63 = vpop.f32.mrf.mxu1  ;;  %v1005_v10 = vmax.f32 %v941_v56, 0.0  ;;  %v1037_v11 = vmax.f32 %v973_v57, 0.0 }
  0xe9   : > { %v942_v2 = vadd.f32 %v2221_v43, %v871_v58  ;;  %v974_v3 = vadd.f32 %v2221_v43, %v903_v59  ;;  %v1008_v4 = vmax.f32 %v944_v60, 0.0  ;;  %v1040_v5 = vmax.f32 %v976_v61, 0.0 }
  0xea   : > { %v876_v6 = vmul.f32 0.999995, %v1942_v62  ;;  %v908_v7 = vmul.f32 0.999995, %v1974_v63  ;;  %v631_v8 = vpop.f32.mrf.mxu0  ;;  %v759_v9 = vpop.f32.mrf.mxu1 }
  0xeb   : > { %v1006_v12 = vmax.f32 %v942_v2, 0.0  ;;  %v1038_v13 = vmax.f32 %v974_v3, 0.0  ;;  %v1709_v14 = vpack.c.bf16 %v1008_v4, %v1007_v0  ;;  %v1789_v15 = vpack.c.bf16 %v1040_v5, %v1039_v1 }
  0xec   : > { %v874_v16 = vmul.f32 0.999995, %v631_v8  ;;  %v906_v17 = vmul.f32 0.999995, %v759_v9  ;;  %v1943_v18 = vpop.f32.mrf.mxu0  ;;  %v1975_v19 = vpop.f32.mrf.mxu1  ;;  %v947_v22 = vadd.f32 %v2221_v43, %v876_v6  ;;  %v979_v23 = vadd.f32 %v2221_v43, %v908_v7 }
  0xed   : > { %v1704_v20 = vpack.c.bf16 %v1006_v12, %v1005_v10  ;;  %v1784_v21 = vpack.c.bf16 %v1038_v13, %v1037_v11  ;;  %1861 = vst [vmem:[%s2236_s6 + $0x8] sm:$0xff] %v1709_v14   ;;  %1877 = vst [vmem:[%s2236_s6 + $0x88] sm:$0xff] %v1789_v15   ;;  %v877_v24 = vmul.f32 0.999995, %v1943_v18  ;;  %v909_v25 = vmul.f32 0.999995, %v1975_v19 }
  0xee   : > { %v634_v26 = vpop.f32.mrf.mxu0  ;;  %v762_v27 = vpop.f32.mrf.mxu1  ;;  %v945_v28 = vadd.f32 %v2221_v43, %v874_v16  ;;  %v977_v29 = vadd.f32 %v2221_v43, %v906_v17  ;;  %v1011_v40 = vmax.f32 %v947_v22, 0.0  ;;  %v1043_v41 = vmax.f32 %v979_v23, 0.0 }
  0xef   : > { %1705 = vst [vmem:[%s2236_s6] sm:$0xff] %v1704_v20   ;;  %1876 = vst [vmem:[%s2236_s6 + $0x80] sm:$0xff] %v1784_v21   ;;  %v875_v30 = vmul.f32 0.999995, %v634_v26  ;;  %v907_v31 = vmul.f32 0.999995, %v762_v27  ;;  %v948_v32 = vadd.f32 %v2221_v43, %v877_v24  ;;  %v980_v33 = vadd.f32 %v2221_v43, %v909_v25 }
  0xf0   : > { %v1946_v34 = vpop.f32.mrf.mxu0  ;;  %v1978_v35 = vpop.f32.mrf.mxu1  ;;  %v1009_v47 = vmax.f32 %v945_v28, 0.0  ;;  %v1041_v48 = vmax.f32 %v977_v29, 0.0 }
  0xf1   : > { %v946_v36 = vadd.f32 %v2221_v43, %v875_v30  ;;  %v978_v37 = vadd.f32 %v2221_v43, %v907_v31  ;;  %v880_v38 = vmul.f32 0.999995, %v1946_v34  ;;  %v912_v39 = vmul.f32 0.999995, %v1978_v35 }
  0xf2   : > { %v1012_v42 = vmax.f32 %v948_v32, 0.0  ;;  %v1044_v44 = vmax.f32 %v980_v33, 0.0  ;;  %v647_v45 = vpop.f32.mrf.mxu0  ;;  %v775_v46 = vpop.f32.mrf.mxu1 }
  0xf3   : > { %v1010_v49 = vmax.f32 %v946_v36, 0.0  ;;  %v1042_v50 = vmax.f32 %v978_v37, 0.0  ;;  %v878_v53 = vmul.f32 0.999995, %v647_v45  ;;  %v910_v54 = vmul.f32 0.999995, %v775_v46 }
  0xf4   : > { %v1719_v51 = vpack.c.bf16 %v1012_v42, %v1011_v40  ;;  %v1799_v52 = vpack.c.bf16 %v1044_v44, %v1043_v41  ;;  %v1947_v55 = vpop.f32.mrf.mxu0  ;;  %v1979_v56 = vpop.f32.mrf.mxu1  ;;  %v951_v59 = vadd.f32 %v2221_v43, %v880_v38  ;;  %v983_v60 = vadd.f32 %v2221_v43, %v912_v39 }
  0xf5   : > { %v1714_v57 = vpack.c.bf16 %v1010_v49, %v1009_v47  ;;  %v1794_v58 = vpack.c.bf16 %v1042_v50, %v1041_v48  ;;  %v881_v61 = vmul.f32 0.999995, %v1947_v55  ;;  %v913_v62 = vmul.f32 0.999995, %v1979_v56 }
  0xf6   : > { %1863 = vst [vmem:[%s2236_s6 + $0x18] sm:$0xff] %v1719_v51   ;;  %1879 = vst [vmem:[%s2236_s6 + $0x98] sm:$0xff] %v1799_v52   ;;  %v650_v63 = vpop.f32.mrf.mxu0  ;;  %v778_v0 = vpop.f32.mrf.mxu1  ;;  %v949_v1 = vadd.f32 %v2221_v43, %v878_v53  ;;  %v981_v2 = vadd.f32 %v2221_v43, %v910_v54  ;;  %v1015_v9 = vmax.f32 %v951_v59, 0.0  ;;  %v1047_v10 = vmax.f32 %v983_v60, 0.0 }
  0xf7   : > { %1862 = vst [vmem:[%s2236_s6 + $0x10] sm:$0xff] %v1714_v57   ;;  %1878 = vst [vmem:[%s2236_s6 + $0x90] sm:$0xff] %v1794_v58   ;;  %v879_v3 = vmul.f32 0.999995, %v650_v63  ;;  %v911_v4 = vmul.f32 0.999995, %v778_v0  ;;  %v952_v5 = vadd.f32 %v2221_v43, %v881_v61  ;;  %v984_v6 = vadd.f32 %v2221_v43, %v913_v62 }
  0xf8   : > { %v1950_v7 = vpop.f32.mrf.mxu0  ;;  %v1982_v8 = vpop.f32.mrf.mxu1  ;;  %v1013_v19 = vmax.f32 %v949_v1, 0.0  ;;  %v1045_v20 = vmax.f32 %v981_v2, 0.0 }
  0xf9   : > { %v950_v11 = vadd.f32 %v2221_v43, %v879_v3  ;;  %v982_v12 = vadd.f32 %v2221_v43, %v911_v4  ;;  %v1016_v13 = vmax.f32 %v952_v5, 0.0  ;;  %v1048_v14 = vmax.f32 %v984_v6, 0.0 }
  0xfa   : > { %v884_v15 = vmul.f32 0.999995, %v1950_v7  ;;  %v916_v16 = vmul.f32 0.999995, %v1982_v8  ;;  %v663_v17 = vpop.f32.mrf.mxu0  ;;  %v791_v18 = vpop.f32.mrf.mxu1 }
  0xfb   : > { %v1014_v21 = vmax.f32 %v950_v11, 0.0  ;;  %v1046_v22 = vmax.f32 %v982_v12, 0.0  ;;  %v1729_v23 = vpack.c.bf16 %v1016_v13, %v1015_v9  ;;  %v1809_v24 = vpack.c.bf16 %v1048_v14, %v1047_v10 }
  0xfc   : > { %v882_v25 = vmul.f32 0.999995, %v663_v17  ;;  %v914_v26 = vmul.f32 0.999995, %v791_v18  ;;  %v1951_v27 = vpop.f32.mrf.mxu0  ;;  %v1983_v28 = vpop.f32.mrf.mxu1  ;;  %v955_v31 = vadd.f32 %v2221_v43, %v884_v15  ;;  %v987_v32 = vadd.f32 %v2221_v43, %v916_v16 }
  0xfd   : > { %v1724_v29 = vpack.c.bf16 %v1014_v21, %v1013_v19  ;;  %v1804_v30 = vpack.c.bf16 %v1046_v22, %v1045_v20  ;;  %1865 = vst [vmem:[%s2236_s6 + $0x28] sm:$0xff] %v1729_v23   ;;  %1881 = vst [vmem:[%s2236_s6 + $0xa8] sm:$0xff] %v1809_v24   ;;  %v885_v33 = vmul.f32 0.999995, %v1951_v27  ;;  %v917_v34 = vmul.f32 0.999995, %v1983_v28 }
  0xfe   : > { %v666_v35 = vpop.f32.mrf.mxu0  ;;  %v794_v36 = vpop.f32.mrf.mxu1  ;;  %v953_v37 = vadd.f32 %v2221_v43, %v882_v25  ;;  %v985_v38 = vadd.f32 %v2221_v43, %v914_v26  ;;  %v1019_v50 = vmax.f32 %v955_v31, 0.0  ;;  %v1051_v51 = vmax.f32 %v987_v32, 0.0 }
  0xff   : > { %1864 = vst [vmem:[%s2236_s6 + $0x20] sm:$0xff] %v1724_v29   ;;  %1880 = vst [vmem:[%s2236_s6 + $0xa0] sm:$0xff] %v1804_v30   ;;  %v883_v39 = vmul.f32 0.999995, %v666_v35  ;;  %v915_v40 = vmul.f32 0.999995, %v794_v36  ;;  %v956_v41 = vadd.f32 %v2221_v43, %v885_v33  ;;  %v988_v42 = vadd.f32 %v2221_v43, %v917_v34 }
 0x100   : > { %v1954_v44 = vpop.f32.mrf.mxu0  ;;  %v1986_v45 = vpop.f32.mrf.mxu1  ;;  %v1017_v56 = vmax.f32 %v953_v37, 0.0  ;;  %v1049_v57 = vmax.f32 %v985_v38, 0.0 }
 0x101   : > { %v954_v46 = vadd.f32 %v2221_v43, %v883_v39  ;;  %v986_v47 = vadd.f32 %v2221_v43, %v915_v40  ;;  %v888_v48 = vmul.f32 0.999995, %v1954_v44  ;;  %v920_v49 = vmul.f32 0.999995, %v1986_v45 }
 0x102   : > { %v1020_v52 = vmax.f32 %v956_v41, 0.0  ;;  %v1052_v53 = vmax.f32 %v988_v42, 0.0  ;;  %v679_v54 = vpop.f32.mrf.mxu0  ;;  %v807_v55 = vpop.f32.mrf.mxu1 }
 0x103   : > { %v1018_v58 = vmax.f32 %v954_v46, 0.0  ;;  %v1050_v59 = vmax.f32 %v986_v47, 0.0  ;;  %v886_v62 = vmul.f32 0.999995, %v679_v54  ;;  %v918_v63 = vmul.f32 0.999995, %v807_v55 }
 0x104   : > { %v1739_v60 = vpack.c.bf16 %v1020_v52, %v1019_v50  ;;  %v1819_v61 = vpack.c.bf16 %v1052_v53, %v1051_v51  ;;  %v1955_v0 = vpop.f32.mrf.mxu0  ;;  %v1987_v1 = vpop.f32.mrf.mxu1  ;;  %v959_v4 = vadd.f32 %v2221_v43, %v888_v48  ;;  %v991_v5 = vadd.f32 %v2221_v43, %v920_v49 }
 0x105   : > { %v1734_v2 = vpack.c.bf16 %v1018_v58, %v1017_v56  ;;  %v1814_v3 = vpack.c.bf16 %v1050_v59, %v1049_v57  ;;  %v889_v6 = vmul.f32 0.999995, %v1955_v0  ;;  %v921_v7 = vmul.f32 0.999995, %v1987_v1 }
 0x106   : > { %1867 = vst [vmem:[%s2236_s6 + $0x38] sm:$0xff] %v1739_v60   ;;  %1883 = vst [vmem:[%s2236_s6 + $0xb8] sm:$0xff] %v1819_v61   ;;  %v682_v8 = vpop.f32.mrf.mxu0  ;;  %v810_v9 = vpop.f32.mrf.mxu1  ;;  %v957_v10 = vadd.f32 %v2221_v43, %v886_v62  ;;  %v989_v11 = vadd.f32 %v2221_v43, %v918_v63  ;;  %v1023_v18 = vmax.f32 %v959_v4, 0.0  ;;  %v1055_v19 = vmax.f32 %v991_v5, 0.0 }
 0x107   : > { %1866 = vst [vmem:[%s2236_s6 + $0x30] sm:$0xff] %v1734_v2   ;;  %1882 = vst [vmem:[%s2236_s6 + $0xb0] sm:$0xff] %v1814_v3   ;;  %v887_v12 = vmul.f32 0.999995, %v682_v8  ;;  %v919_v13 = vmul.f32 0.999995, %v810_v9  ;;  %v960_v14 = vadd.f32 %v2221_v43, %v889_v6  ;;  %v992_v15 = vadd.f32 %v2221_v43, %v921_v7 }
 0x108   : > { %v1958_v16 = vpop.f32.mrf.mxu0  ;;  %v1990_v17 = vpop.f32.mrf.mxu1  ;;  %v1021_v28 = vmax.f32 %v957_v10, 0.0  ;;  %v1053_v29 = vmax.f32 %v989_v11, 0.0 }
 0x109   : > { %v958_v20 = vadd.f32 %v2221_v43, %v887_v12  ;;  %v990_v21 = vadd.f32 %v2221_v43, %v919_v13  ;;  %v1024_v22 = vmax.f32 %v960_v14, 0.0  ;;  %v1056_v23 = vmax.f32 %v992_v15, 0.0 }
 0x10a   : > { %v892_v24 = vmul.f32 0.999995, %v1958_v16  ;;  %v924_v25 = vmul.f32 0.999995, %v1990_v17  ;;  %v695_v26 = vpop.f32.mrf.mxu0  ;;  %v823_v27 = vpop.f32.mrf.mxu1 }
 0x10b   : > { %v1022_v30 = vmax.f32 %v958_v20, 0.0  ;;  %v1054_v31 = vmax.f32 %v990_v21, 0.0  ;;  %v1749_v32 = vpack.c.bf16 %v1024_v22, %v1023_v18  ;;  %v1829_v33 = vpack.c.bf16 %v1056_v23, %v1055_v19 }
 0x10c   : > { %v890_v34 = vmul.f32 0.999995, %v695_v26  ;;  %v922_v35 = vmul.f32 0.999995, %v823_v27  ;;  %v1959_v36 = vpop.f32.mrf.mxu0  ;;  %v1991_v37 = vpop.f32.mrf.mxu1  ;;  %v963_v40 = vadd.f32 %v2221_v43, %v892_v24  ;;  %v995_v41 = vadd.f32 %v2221_v43, %v924_v25 }
 0x10d   : > { %v1744_v38 = vpack.c.bf16 %v1022_v30, %v1021_v28  ;;  %v1824_v39 = vpack.c.bf16 %v1054_v31, %v1053_v29  ;;  %1869 = vst [vmem:[%s2236_s6 + $0x48] sm:$0xff] %v1749_v32   ;;  %1885 = vst [vmem:[%s2236_s6 + $0xc8] sm:$0xff] %v1829_v33   ;;  %v893_v42 = vmul.f32 0.999995, %v1959_v36  ;;  %v925_v44 = vmul.f32 0.999995, %v1991_v37 }
 0x10e   : > { %v698_v45 = vpop.f32.mrf.mxu0  ;;  %v826_v46 = vpop.f32.mrf.mxu1  ;;  %v961_v47 = vadd.f32 %v2221_v43, %v890_v34  ;;  %v993_v48 = vadd.f32 %v2221_v43, %v922_v35  ;;  %v1027_v59 = vmax.f32 %v963_v40, 0.0  ;;  %v1059_v60 = vmax.f32 %v995_v41, 0.0 }
 0x10f   : > { %1868 = vst [vmem:[%s2236_s6 + $0x40] sm:$0xff] %v1744_v38   ;;  %1884 = vst [vmem:[%s2236_s6 + $0xc0] sm:$0xff] %v1824_v39   ;;  %v891_v49 = vmul.f32 0.999995, %v698_v45  ;;  %v923_v50 = vmul.f32 0.999995, %v826_v46  ;;  %v964_v51 = vadd.f32 %v2221_v43, %v893_v42  ;;  %v996_v52 = vadd.f32 %v2221_v43, %v925_v44 }
 0x110   : > { %v1962_v53 = vpop.f32.mrf.mxu0  ;;  %v1994_v54 = vpop.f32.mrf.mxu1  ;;  %v1025_v1 = vmax.f32 %v961_v47, 0.0  ;;  %v1057_v2 = vmax.f32 %v993_v48, 0.0 }
 0x111   : > { %v962_v55 = vadd.f32 %v2221_v43, %v891_v49  ;;  %v994_v56 = vadd.f32 %v2221_v43, %v923_v50  ;;  %v896_v57 = vmul.f32 0.999995, %v1962_v53  ;;  %v928_v58 = vmul.f32 0.999995, %v1994_v54 }
 0x112   : > { %v1028_v61 = vmax.f32 %v964_v51, 0.0  ;;  %v1060_v62 = vmax.f32 %v996_v52, 0.0  ;;  %v711_v63 = vpop.f32.mrf.mxu0  ;;  %v839_v0 = vpop.f32.mrf.mxu1 }
 0x113   : > { %v1026_v3 = vmax.f32 %v962_v55, 0.0  ;;  %v1058_v4 = vmax.f32 %v994_v56, 0.0  ;;  %v894_v7 = vmul.f32 0.999995, %v711_v63  ;;  %v926_v8 = vmul.f32 0.999995, %v839_v0 }
 0x114   : > { %v1759_v5 = vpack.c.bf16 %v1028_v61, %v1027_v59  ;;  %v1839_v6 = vpack.c.bf16 %v1060_v62, %v1059_v60  ;;  %v1963_v9 = vpop.f32.mrf.mxu0  ;;  %v1995_v10 = vpop.f32.mrf.mxu1  ;;  %v967_v13 = vadd.f32 %v2221_v43, %v896_v57  ;;  %v999_v14 = vadd.f32 %v2221_v43, %v928_v58 }
 0x115   : > { %v1754_v11 = vpack.c.bf16 %v1026_v3, %v1025_v1  ;;  %v1834_v12 = vpack.c.bf16 %v1058_v4, %v1057_v2  ;;  %v897_v15 = vmul.f32 0.999995, %v1963_v9  ;;  %v929_v16 = vmul.f32 0.999995, %v1995_v10 }
 0x116   : > { %1871 = vst [vmem:[%s2236_s6 + $0x58] sm:$0xff] %v1759_v5   ;;  %1887 = vst [vmem:[%s2236_s6 + $0xd8] sm:$0xff] %v1839_v6   ;;  %v714_v17 = vpop.f32.mrf.mxu0  ;;  %v842_v18 = vpop.f32.mrf.mxu1  ;;  %v965_v19 = vadd.f32 %v2221_v43, %v894_v7  ;;  %v997_v20 = vadd.f32 %v2221_v43, %v926_v8  ;;  %v1031_v27 = vmax.f32 %v967_v13, 0.0  ;;  %v1063_v28 = vmax.f32 %v999_v14, 0.0 }
 0x117   : > { %1870 = vst [vmem:[%s2236_s6 + $0x50] sm:$0xff] %v1754_v11   ;;  %1886 = vst [vmem:[%s2236_s6 + $0xd0] sm:$0xff] %v1834_v12   ;;  %v895_v21 = vmul.f32 0.999995, %v714_v17  ;;  %v927_v22 = vmul.f32 0.999995, %v842_v18  ;;  %v968_v23 = vadd.f32 %v2221_v43, %v897_v15  ;;  %v1000_v24 = vadd.f32 %v2221_v43, %v929_v16 }
 0x118   : > { %v1966_v25 = vpop.f32.mrf.mxu0  ;;  %v1998_v26 = vpop.f32.mrf.mxu1  ;;  %v1029_v37 = vmax.f32 %v965_v19, 0.0  ;;  %v1061_v38 = vmax.f32 %v997_v20, 0.0 }
 0x119   : > { %v966_v29 = vadd.f32 %v2221_v43, %v895_v21  ;;  %v998_v30 = vadd.f32 %v2221_v43, %v927_v22  ;;  %v1032_v31 = vmax.f32 %v968_v23, 0.0  ;;  %v1064_v32 = vmax.f32 %v1000_v24, 0.0 }
 0x11a   : > { %v900_v33 = vmul.f32 0.999995, %v1966_v25  ;;  %v932_v34 = vmul.f32 0.999995, %v1998_v26  ;;  %v727_v35 = vpop.f32.mrf.mxu0  ;;  %v855_v36 = vpop.f32.mrf.mxu1 }
 0x11b   : > { %v1030_v39 = vmax.f32 %v966_v29, 0.0  ;;  %v1062_v40 = vmax.f32 %v998_v30, 0.0  ;;  %v1769_v41 = vpack.c.bf16 %v1032_v31, %v1031_v27  ;;  %v1849_v42 = vpack.c.bf16 %v1064_v32, %v1063_v28 }
 0x11c   : > { %v898_v44 = vmul.f32 0.999995, %v727_v35  ;;  %v930_v45 = vmul.f32 0.999995, %v855_v36  ;;  %v1967_v46 = vpop.f32.mrf.mxu0  ;;  %v1999_v47 = vpop.f32.mrf.mxu1  ;;  %v971_v50 = vadd.f32 %v2221_v43, %v900_v33  ;;  %v1003_v51 = vadd.f32 %v2221_v43, %v932_v34 }
 0x11d   : > { %v1764_v48 = vpack.c.bf16 %v1030_v39, %v1029_v37  ;;  %v1844_v49 = vpack.c.bf16 %v1062_v40, %v1061_v38  ;;  %1873 = vst [vmem:[%s2236_s6 + $0x68] sm:$0xff] %v1769_v41   ;;  %1889 = vst [vmem:[%s2236_s6 + $0xe8] sm:$0xff] %v1849_v42   ;;  %v901_v52 = vmul.f32 0.999995, %v1967_v46  ;;  %v933_v53 = vmul.f32 0.999995, %v1999_v47 }
 0x11e   : > { %v730_v54 = vpop.f32.mrf.mxu0  ;;  %v858_v55 = vpop.f32.mrf.mxu1  ;;  %v969_v56 = vadd.f32 %v2221_v43, %v898_v44  ;;  %v1001_v57 = vadd.f32 %v2221_v43, %v930_v45  ;;  %v1035_v0 = vmax.f32 %v971_v50, 0.0  ;;  %v1067_v1 = vmax.f32 %v1003_v51, 0.0 }
 0x11f   : > { %1872 = vst [vmem:[%s2236_s6 + $0x60] sm:$0xff] %v1764_v48   ;;  %1888 = vst [vmem:[%s2236_s6 + $0xe0] sm:$0xff] %v1844_v49   ;;  %v899_v58 = vmul.f32 0.999995, %v730_v54  ;;  %v931_v59 = vmul.f32 0.999995, %v858_v55  ;;  %v972_v60 = vadd.f32 %v2221_v43, %v901_v52  ;;  %v1004_v61 = vadd.f32 %v2221_v43, %v933_v53 }
 0x120   : > { %v1033_v4 = vmax.f32 %v969_v56, 0.0  ;;  %v1065_v5 = vmax.f32 %v1001_v57, 0.0 }
 0x121   : > { %v970_v62 = vadd.f32 %v2221_v43, %v899_v58  ;;  %v1002_v63 = vadd.f32 %v2221_v43, %v931_v59  ;;  %v1036_v2 = vmax.f32 %v972_v60, 0.0  ;;  %v1068_v3 = vmax.f32 %v1004_v61, 0.0 }
 0x123   : > { %v1034_v6 = vmax.f32 %v970_v62, 0.0  ;;  %v1066_v7 = vmax.f32 %v1002_v63, 0.0  ;;  %v1779_v8 = vpack.c.bf16 %v1036_v2, %v1035_v0  ;;  %v1859_v9 = vpack.c.bf16 %v1068_v3, %v1067_v1 }
 0x125   : > { %v1774_v10 = vpack.c.bf16 %v1034_v6, %v1033_v4  ;;  %v1854_v11 = vpack.c.bf16 %v1066_v7, %v1065_v5  ;;  %1875 = vst [vmem:[%s2236_s6 + $0x78] sm:$0xff] %v1779_v8   ;;  %1891 = vst [vmem:[%s2236_s6 + $0xf8] sm:$0xff] %v1859_v9  }
 0x127   : > { %1874 = vst [vmem:[%s2236_s6 + $0x70] sm:$0xff] %v1774_v10   ;;  %1890 = vst [vmem:[%s2236_s6 + $0xf0] sm:$0xff] %v1854_v11  }
 0x128 PF: > { %s13_s14 = sadd.s32 1, %s2091_s14   ;;  %s2339_s12 = smov %s2087_s13 }
 0x129   : > { %p10_p5 = scmp.ge.s32.totalorder %s13_s14, 18   ;;  %s2340_s13 = smov %s2342_s15 }
 0x12b   :  { %12 = sbr.rel (!%p10_p5) target bundleno = 2 (0x2), region = 68 }

</bundles_post_ra>
